<compile_context>
chip_gen: v5e
topology: v5e:2x2
jax: 0.10.0
libtpu: 0.0.40
codegen_flags: <defaults>
</compile_context>

<pallas_src>
import jax
import jax.numpy as jnp
import numpy as np
from jax.experimental import pallas as pl
from jax.experimental.pallas import tpu as pltpu

_BN_EPS = 1e-5
_LANE = 128
_VMEM_CAP = 48 * 2**20          # stay well under v7x's 64 MiB physical VMEM


def _round_up(x, m):
    return (x + m - 1) // m * m


def _gelu_exact(z):
    """Exact (erf-based) GELU, factored to avoid the sign select.

    gelu(z) = 0.5*(z + |z|*erf(|z|/sqrt2)); erf via Abramowitz-Stegun 7.1.26.
    """
    p = 0.3275911
    a1, a2, a3, a4, a5 = (0.254829592, -0.284496736, 1.421413741,
                          -1.453152027, 1.061405429)
    az = jnp.abs(z)
    u = az * 0.7071067811865476
    t = 1.0 / (1.0 + p * u)
    poly = ((((a5 * t + a4) * t + a3) * t + a2) * t + a1) * t
    erf_term = az - az * poly * jnp.exp(-u * u)      # = |z| * erf(|z|/sqrt2)
    return 0.5 * (z + erf_term)


# ------------------------------ module wrapper -------------------------------
class FeatureDecoderBlockPallas:
    def __init__(self, key, in_channels, conv_t, bias=False, repeat=1,
                 compute_dtype=jnp.bfloat16, max_tile_rows=1024):
        assert not bias, "module default is bias=False"
        out_channels, kernel_size, stride = conv_t
        if repeat > 1 or stride == 1:
            assert kernel_size % 2 == 1, "same-padding convs assume odd kernel"
        self.in_channels = in_channels
        self.out_channels = out_channels
        self.kernel_size = kernel_size
        self.stride = stride
        self.repeat = repeat
        self.compute_dtype = compute_dtype
        self.max_tile_rows = max(8, max_tile_rows)
        self.cp = _round_up(out_channels, _LANE)     # lane-dense channel width
        self.s_eff = stride if stride > 1 else 1
        # intermediate y dtype: bf16 HBM round trip on the bf16-matmul path,
        # f32 on the exactness path (perf review, correctness note 4).
        self.inter_dtype = (jnp.float32
                            if np.dtype(compute_dtype) == np.dtype(jnp.float32)
                            else jnp.bfloat16)

        keys = jax.random.split(key, repeat + 2)
        # ---- logical (unpadded, f32) parameters; also used by the reference --
        self.same_w = []                             # list of (K, Cin_r, Cout)
        c_in = in_channels
        for r in range(repeat - 1):
            w = jax.random.normal(keys[r], (kernel_size, c_in, out_channels),
                                  jnp.float32) / np.sqrt(c_in * kernel_size)
            self.same_w.append(w)
            c_in = out_channels
        if stride > 1:
            # ConvTranspose1d(kernel=stride, stride=stride) stored (Cin, S, Cout)
            self.wt = jax.random.normal(
                keys[repeat - 1], (c_in, stride, out_channels),
                jnp.float32) / np.sqrt(c_in * stride)
        else:
            self.wt = None
            self.same_w.append(
                jax.random.normal(keys[repeat - 1],
                                  (kernel_size, c_in, out_channels),
                                  jnp.float32) / np.sqrt(c_in * kernel_size))
        self.gamma = 1.0 + 0.1 * jax.random.normal(keys[repeat],
                                                   (out_channels,), jnp.float32)
        self.beta = 0.1 * jax.random.normal(keys[repeat + 1],
                                            (out_channels,), jnp.float32)

        # ---- kernel-side params: channel-padded, tap-concatenated, cast ------
        cp = self.cp
        self.same_w_cat = []                         # (K*Cin_p, Cp) per layer
        for r, w in enumerate(self.same_w):
            k, cin_l, cout_l = w.shape
            cin_p = cin_l if r == 0 else cp
            wp = jnp.zeros((k, cin_p, cp), jnp.float32)
            wp = wp.at[:, :cin_l, :cout_l].set(w)
            self.same_w_cat.append(
                wp.reshape(k * cin_p, cp).astype(compute_dtype))
        if self.wt is not None:
            cin_l = self.wt.shape[0]
            cin_p = cin_l if repeat == 1 else cp
            wtp = jnp.zeros((cin_p, stride, cp), jnp.float32)
            wtp = wtp.at[:cin_l, :, :out_channels].set(self.wt)
            self.wt_p = wtp.reshape(cin_p, stride * cp).astype(compute_dtype)
        else:
            self.wt_p = None
        self.gamma_p = jnp.zeros((cp,), jnp.float32).at[:out_channels].set(self.gamma)
        self.beta_p = jnp.zeros((cp,), jnp.float32).at[:out_channels].set(self.beta)

    # ----------------------- pass A: fused convs + stats ----------------------
    def _fused_convs(self, xwin, length, tl, tlh):
        n, t_tiles = xwin.shape[0], xwin.shape[1]
        c_in = xwin.shape[-1]
        cp, s_eff = self.cp, self.s_eff
        w_out = s_eff * cp
        kk = self.kernel_size
        cdt = self.compute_dtype
        y_dtype = self.inter_dtype
        n_same = len(self.same_w_cat)
        has_t = self.wt_p is not None
        partial_tail = (t_tiles * tl != length)

        def kernel(*refs):
            xw_ref = refs[0]
            same_refs = refs[1:1 + n_same]
            pos = 1 + n_same
            wt_ref = refs[pos] if has_t else None
            pos += 1 if has_t else 0
            y_ref, stats_ref, stat_acc = refs[pos], refs[pos + 1], refs[pos + 2]

            t = pl.program_id(1)

            # --- fused conv chain: one im2col matmul per layer (MXU-filling) --
            h = xw_ref[...]                                   # (tlh, c_in)
            for w_ref in same_refs:
                hc = h.astype(cdt)                            # cast hoisted out of tap loop
                taps = [hc] + [pltpu.roll(hc, shift=(tlh - k) % tlh, axis=0)
                               for k in range(1, kk)]
                hcat = jnp.concatenate(taps, axis=-1)         # (tlh, kk*cin)
                h = jnp.dot(hcat, w_ref[...],
                            preferred_element_type=jnp.float32)   # (tlh, cp) f32
            hv = h[:tl, :]                                    # valid rows only
            if has_t:
                # ConvTranspose1d(k=stride, s=stride): the S output phases are
                # packed along lanes -> lane-dense (tl, S*CP) store.
                y_full = jnp.dot(hv.astype(cdt), wt_ref[...],
                                 preferred_element_type=jnp.float32)
            else:
                y_full = hv
            y_ref[...] = y_full.astype(y_ref.dtype)

            # --- BN partials for this tile (masked iff the tail is partial) ---
            if partial_tail:
                valid = jnp.minimum(tl, length - t * tl)
                mask = (jax.lax.broadcasted_iota(jnp.int32, (tl, 1), 0)
                        < valid).astype(jnp.float32)
                cnt = valid.astype(jnp.float32) * float(s_eff)
            else:
                mask = None
                cnt = float(tl * s_eff)

            ch_sum = jnp.zeros((1, cp), jnp.float32)
            for s in range(s_eff):
                blk = y_full[:, s * cp:(s + 1) * cp]
                if mask is not None:
                    blk = blk * mask
                ch_sum = ch_sum + jnp.sum(blk, axis=0, keepdims=True)
            mean_t = ch_sum / cnt
            m2_t = jnp.zeros((1, cp), jnp.float32)
            for s in range(s_eff):
                d = y_full[:, s * cp:(s + 1) * cp] - mean_t
                if mask is not None:
                    d = d * mask
                m2_t = m2_t + jnp.sum(d * d, axis=0, keepdims=True)

            # --- running Chan combine across L-tiles (VMEM-resident scratch) --
            @pl.when(t == 0)
            def _():
                stat_acc[...] = jnp.zeros_like(stat_acc)

            count_prev = t.astype(jnp.float32) * float(tl * s_eff)
            n_ab = count_prev + cnt
            frac = cnt / n_ab
            mean_a = stat_acc[0:1, :]
            delta = mean_t - mean_a
            stat_acc[0:1, :] = mean_a + delta * frac
            stat_acc[1:2, :] = (stat_acc[1:2, :] + m2_t
                                + delta * delta * (count_prev * frac))

            @pl.when(t == t_tiles - 1)
            def _():
                stats_ref[...] = stat_acc[...]    # rows 0=mean, 1=M2, rest 0

        in_specs = [pl.BlockSpec((None, None, tlh, c_in),
                                 lambda b, t: (b, t, 0, 0))]
        operands = [xwin]
        for w in self.same_w_cat:
            in_specs.append(pl.BlockSpec(w.shape, lambda b, t: (0, 0)))
            operands.append(w)
        if has_t:
            in_specs.append(pl.BlockSpec(self.wt_p.shape, lambda b, t: (0, 0)))
            operands.append(self.wt_p)

        out_shape = (jax.ShapeDtypeStruct((n, t_tiles * tl, w_out), y_dtype),
                     jax.ShapeDtypeStruct((n, 8, cp), jnp.float32))
        out_specs = [pl.BlockSpec((None, tl, w_out), lambda b, t: (b, t, 0)),
                     pl.BlockSpec((None, 8, cp), lambda b, t: (b, 0, 0))]

        cdt_size = np.dtype(cdt).itemsize
        y_size = np.dtype(y_dtype).itemsize
        x_size = np.dtype(xwin.dtype).itemsize
        est = (2 * tlh * c_in * x_size                  # windows (dbl-buffered)
               + 2 * tl * w_out * y_size                # y out (dbl-buffered)
               + sum(int(np.prod(w.shape)) * cdt_size for w in self.same_w_cat)
               + (int(np.prod(self.wt_p.shape)) * cdt_size if has_t else 0)
               + tlh * cp * 4                           # h (f32)
               + tlh * kk * max(cp, c_in) * cdt_size    # im2col concat
               + 2 * tl * w_out * 4                     # y_full f32 + slack
               + 4 * 8 * cp * 4)                        # stats out + scratch
        vmem_limit = int(min(_VMEM_CAP, max(32 * 2**20, 2 * est)))

        return pl.pallas_call(
            kernel,
            out_shape=out_shape,
            grid=(n, t_tiles),
            in_specs=in_specs,
            out_specs=out_specs,
            scratch_shapes=[pltpu.VMEM((8, cp), jnp.float32)],
            compiler_params=pltpu.CompilerParams(
                # batch "parallel" (v7x megacore), L-tiles "arbitrary" so the
                # stats scratch can accumulate across the tile sweep.
                # TODO(synk): if N == 1 on v7x, split the L axis in two and make
                # the outer half "parallel" to recover 2-TC sharding.
                dimension_semantics=("parallel", "arbitrary"),
                vmem_limit_bytes=vmem_limit),
        )(*operands)

    # ---------------------- pass B: BN apply + exact GELU ---------------------
    def _bn_gelu(self, y2, scale2, shift2, tm, out_dtype):
        m, w = y2.shape
        assert m % tm == 0

        def kernel(y_ref, s_ref, b_ref, o_ref):
            z = y_ref[...].astype(jnp.float32) * s_ref[...] + b_ref[...]
            o_ref[...] = _gelu_exact(z).astype(o_ref.dtype)

        vmem_limit = int(min(_VMEM_CAP, max(16 * 2**20, 10 * tm * w * 4)))
        return pl.pallas_call(
            kernel,
            out_shape=jax.ShapeDtypeStruct((m, w), out_dtype),
            grid=(m // tm,),
            in_specs=[pl.BlockSpec((tm, w), lambda i: (i, 0)),
                      pl.BlockSpec((1, w), lambda i: (0, 0)),
                      pl.BlockSpec((1, w), lambda i: (0, 0))],
            out_specs=pl.BlockSpec((tm, w), lambda i: (i, 0)),
            compiler_params=pltpu.CompilerParams(
                dimension_semantics=("parallel",),
                vmem_limit_bytes=vmem_limit),
        )(y2, scale2, shift2)

    # --------------------------------- forward --------------------------------
    def __call__(self, x_ncl):
        n, c_in, length = x_ncl.shape
        assert c_in == self.in_channels
        cp, s_eff = self.cp, self.s_eff
        w_out = s_eff * cp
        pad = self.kernel_size // 2
        halo = len(self.same_w) * pad

        # TODO(synk): both NCL<->NLC edge transposes (and the final channel
        # slice) disappear if the surrounding model keeps activations
        # channels-last; they are left to XLA here to preserve the interface.
        x_nlc = jnp.transpose(x_ncl, (0, 2, 1))               # (N, L, Cin)

        # L-tile size: any multiple of 8 (no divisor search); the last tile may
        # be partial and is masked out of the BN statistics.
        y_isize = np.dtype(self.inter_dtype).itemsize
        tl = min(self.max_tile_rows,
                 max(64, min(1024, (2 * 1024 * 1024) // max(1, w_out * y_isize))))
        tl -= tl % 8
        tl = min(tl, _round_up(length, 8))
        t_tiles = -(-length // tl)
        tlh = _round_up(tl + 2 * halo, 8)

        # One zero-pad of the raw input covers the halo of the whole fused conv
        # chain; overlapping windows are materialized host-side so Pass A's
        # input tile goes through a normal BlockSpec (auto double-buffered).
        pad_after = (t_tiles - 1) * tl + tlh - halo - length
        x_pad = jnp.pad(x_nlc, ((0, 0), (halo, pad_after), (0, 0)))
        if t_tiles == 1:
            xwin = x_pad[:, None, :tlh, :]
        else:
            idx = np.arange(t_tiles)[:, None] * tl + np.arange(tlh)[None, :]
            xwin = jnp.take(x_pad, jnp.asarray(idx, dtype=jnp.int32), axis=1)

        y, stats = self._fused_convs(xwin, length, tl, tlh)

        # Combine per-batch-row (mean, centered M2) partials -> BN scale/shift.
        count_b = float(length * s_eff)                        # rows per batch
        mean_b = stats[:, 0, :]                                # (N, CP)
        m2_b = stats[:, 1, :]
        mean = jnp.mean(mean_b, axis=0)
        m2 = jnp.sum(m2_b, axis=0) + count_b * jnp.sum((mean_b - mean) ** 2, axis=0)
        var = m2 / (n * count_b)                               # biased (training BN)
        inv = jax.lax.rsqrt(var + _BN_EPS)
        scale = self.gamma_p * inv
        shift = self.beta_p - mean * scale
        scale2 = jnp.tile(scale, s_eff).reshape(1, w_out)
        shift2 = jnp.tile(shift, s_eff).reshape(1, w_out)

        # BN apply + exact GELU over lane-dense row tiles (tile = Pass-A tile).
        y2 = y.reshape(n * t_tiles * tl, w_out)
        out2 = self._bn_gelu(y2, scale2, shift2, tm=tl, out_dtype=x_ncl.dtype)
        out3 = out2.reshape(n, t_tiles * tl * s_eff, cp)
        out = jnp.transpose(out3[:, :length * s_eff, :self.out_channels],
                            (0, 2, 1))                         # (N, Cout, L_out)
        return out


# -------------------------------- pure-JAX ref --------------------------------
def reference_forward(block, x_ncl):
    x = jnp.transpose(x_ncl, (0, 2, 1)).astype(jnp.float32)

    def conv_same(x, w):
        k = w.shape[0]
        pad = k // 2
        l_out = x.shape[1] + 2 * pad - k + 1
        xp = jnp.pad(x, ((0, 0), (pad, pad), (0, 0)))
        return sum(jnp.einsum('nlc,co->nlo', xp[:, i:i + l_out, :], w[i])
                   for i in range(k))

    for w in block.same_w:
        x = conv_same(x, w)
    if block.stride > 1:
        y = jnp.einsum('nlc,cso->nlso', x, block.wt)
        n, l, s, c = y.shape
        y = y.reshape(n, l * s, c)
    else:
        y = x
    mean = jnp.mean(y, axis=(0, 1), keepdims=True)
    var = jnp.mean((y - mean) ** 2, axis=(0, 1), keepdims=True)
    y = (y - mean) * jax.lax.rsqrt(var + _BN_EPS) * block.gamma + block.beta
    y = jax.nn.gelu(y, approximate=False)
    return jnp.transpose(y, (0, 2, 1))


if __name__ == "__main__":
    key = jax.random.PRNGKey(0)
    k_x, k_p, k_x2 = jax.random.split(key, 3)
    N, C_IN, L = 2, 8, 64
    conv_t = (8, 3, 2)             # out_channels=8, kernel_size=3, stride=2
    x = jax.random.normal(k_x, (N, C_IN, L), jnp.float32)

    # f32-matmul / f32-intermediate path: tight check vs the pure-JAX reference.
    blk32 = FeatureDecoderBlockPallas(k_p, C_IN, conv_t, bias=False, repeat=2,
                                      compute_dtype=jnp.float32)
    out32 = jax.block_until_ready(blk32(x))
    assert out32.shape == (N, conv_t[0], L * conv_t[2]), out32.shape
    ref = jax.block_until_ready(reference_forward(blk32, x))
    np.testing.assert_allclose(np.asarray(out32), np.asarray(ref),
                               rtol=1e-4, atol=1e-4)

    # bf16-matmul / bf16-intermediate path (v6e/v7x fast path): loose check.
    blk16 = FeatureDecoderBlockPallas(k_p, C_IN, conv_t, bias=False, repeat=2,
                                      compute_dtype=jnp.bfloat16)
    out16 = jax.block_until_ready(blk16(x))
    np.testing.assert_allclose(np.asarray(out16), np.asarray(ref),
                               rtol=1e-1, atol=1e-1)

    # stride == 1 / repeat == 1 branch (plain Conv1d -> BN -> GELU).
    blk_s1 = FeatureDecoderBlockPallas(k_p, C_IN, (8, 3, 1), bias=False,
                                       repeat=1, compute_dtype=jnp.float32)
    out_s1 = jax.block_until_ready(blk_s1(x))
    ref_s1 = jax.block_until_ready(reference_forward(blk_s1, x))
    np.testing.assert_allclose(np.asarray(out_s1), np.asarray(ref_s1),
                               rtol=1e-4, atol=1e-4)

    # multi-tile with a partial last tile: exercises the masked BN partials and
    # the in-kernel Chan accumulation across the "arbitrary" L-tile axis.
    L2 = 80
    x2 = jax.random.normal(k_x2, (N, C_IN, L2), jnp.float32)
    blk_pt = FeatureDecoderBlockPallas(k_p, C_IN, conv_t, bias=False, repeat=2,
                                       compute_dtype=jnp.float32,
                                       max_tile_rows=32)
    out_pt = jax.block_until_ready(blk_pt(x2))
    ref_pt = jax.block_until_ready(reference_forward(blk_pt, x2))
    np.testing.assert_allclose(np.asarray(out_pt), np.asarray(ref_pt),
                               rtol=1e-4, atol=1e-4)

    print("KERNEL_OK")
</pallas_src>

<mosaic_0001>
module attributes {stable_mosaic.version = 11 : i64} {
  func.func @kernel(%arg0: i32, %arg1: i32, %arg2: memref<1x1x72x8xf32, #tpu.memory_space<vmem>>, %arg3: memref<24x128xf32, #tpu.memory_space<vmem>>, %arg4: memref<128x256xf32, #tpu.memory_space<vmem>>, %arg5: memref<1x64x256xf32, #tpu.memory_space<vmem>>, %arg6: memref<1x8x128xf32, #tpu.memory_space<vmem>>, %arg7: memref<8x128xf32, #tpu.memory_space<vmem>>) attributes {dimension_semantics = [#tpu.dimension_semantics<parallel>, #tpu.dimension_semantics<arbitrary>], iteration_bounds = array<i64: 2, 1>, scalar_prefetch = 0 : i64, scratch_operands = 1 : i64, tpu.core_type = #tpu.core_type<tc>, window_params = [{transform_indices = @transform_0, window_bounds = array<i64: 1, 1, 72, 8>}, {pipeline_mode = #tpu.pipeline_mode<synchronous>, transform_indices = @transform_1, window_bounds = array<i64: 24, 128>}, {pipeline_mode = #tpu.pipeline_mode<synchronous>, transform_indices = @transform_2, window_bounds = array<i64: 128, 256>}, {transform_indices = @transform_3, window_bounds = array<i64: 1, 64, 256>}, {transform_indices = @transform_4, window_bounds = array<i64: 1, 8, 128>}]} {
    %c0 = arith.constant 0 : index
    %c0_0 = arith.constant 0 : index
    %c0_1 = arith.constant 0 : index
    %c0_2 = arith.constant 0 : index
    %0 = vector.load %arg2[%c0, %c0_0, %c0_1, %c0_2] : memref<1x1x72x8xf32, #tpu.memory_space<vmem>>, vector<1x1x72x8xf32>
    %1 = vector.shape_cast %0 : vector<1x1x72x8xf32> to vector<72x8xf32>
    %c71_i32 = arith.constant 71 : i32
    %2 = tpu.dynamic_rotate %1 by %c71_i32 dim 0 : vector<72x8xf32>, i32 -> vector<72x8xf32>
    %c70_i32 = arith.constant 70 : i32
    %3 = tpu.dynamic_rotate %1 by %c70_i32 dim 0 : vector<72x8xf32>, i32 -> vector<72x8xf32>
    %4 = tpu.concatenate %1, %2, %3 in 1 : vector<72x8xf32>, vector<72x8xf32>, vector<72x8xf32> -> vector<72x24xf32>
    %c0_3 = arith.constant 0 : index
    %c0_4 = arith.constant 0 : index
    %5 = vector.load %arg3[%c0_3, %c0_4] : memref<24x128xf32, #tpu.memory_space<vmem>>, vector<24x128xf32>
    %cst = arith.constant dense<0.000000e+00> : vector<72x128xf32>
    %6 = tpu.matmul %4, %5, %cst {dimension_numbers = #tpu.dot_dimension_numbers<[1], [0], [0], [1], [0, 0, 1, 1], [], []>} : vector<72x24xf32>, vector<24x128xf32>, vector<72x128xf32> -> vector<72x128xf32>
    %7 = vector.extract_strided_slice %6 {offsets = [0, 0], sizes = [64, 128], strides = [1, 1]} : vector<72x128xf32> to vector<64x128xf32>
    %c0_5 = arith.constant 0 : index
    %c0_6 = arith.constant 0 : index
    %8 = vector.load %arg4[%c0_5, %c0_6] : memref<128x256xf32, #tpu.memory_space<vmem>>, vector<128x256xf32>
    %cst_7 = arith.constant dense<0.000000e+00> : vector<64x256xf32>
    %9 = tpu.matmul %7, %8, %cst_7 {dimension_numbers = #tpu.dot_dimension_numbers<[1], [0], [0], [1], [0, 0, 1, 1], [], []>} : vector<64x128xf32>, vector<128x256xf32>, vector<64x256xf32> -> vector<64x256xf32>
    %c0_8 = arith.constant 0 : index
    %c0_9 = arith.constant 0 : index
    %c0_10 = arith.constant 0 : index
    %10 = vector.load %arg5[%c0_8, %c0_9, %c0_10] : memref<1x64x256xf32, #tpu.memory_space<vmem>>, vector<1x64x256xf32>
    %11 = vector.shape_cast %10 : vector<1x64x256xf32> to vector<64x256xf32>
    %12 = vector.shape_cast %9 : vector<64x256xf32> to vector<1x64x256xf32>
    tpu.vector_store %arg5[%c0_8, %c0_9, %c0_10], %12 {strides = array<i32>} : memref<1x64x256xf32, #tpu.memory_space<vmem>>, vector<1x64x256xf32>,
    %cst_11 = arith.constant 0.000000e+00 : f32
    %13 = vector.broadcast %cst_11 : f32 to vector<1x128xf32>
    %14 = vector.extract_strided_slice %9 {offsets = [0, 0], sizes = [64, 128], strides = [1, 1]} : vector<64x256xf32> to vector<64x128xf32>
    %cst_12 = arith.constant dense<0.000000e+00> : vector<128xf32>
    %15 = vector.multi_reduction <add>, %14, %cst_12 [0] : vector<64x128xf32> to vector<128xf32>
    %16 = vector.shape_cast %15 : vector<128xf32> to vector<1x128xf32>
    %17 = arith.addf %13, %16 : vector<1x128xf32>
    %18 = vector.extract_strided_slice %9 {offsets = [0, 128], sizes = [64, 128], strides = [1, 1]} : vector<64x256xf32> to vector<64x128xf32>
    %cst_13 = arith.constant dense<0.000000e+00> : vector<128xf32>
    %19 = vector.multi_reduction <add>, %18, %cst_13 [0] : vector<64x128xf32> to vector<128xf32>
    %20 = vector.shape_cast %19 : vector<128xf32> to vector<1x128xf32>
    %21 = arith.addf %17, %20 : vector<1x128xf32>
    %cst_14 = arith.constant 1.280000e+02 : f32
    %22 = vector.broadcast %cst_14 : f32 to vector<1x128xf32>
    %23 = arith.divf %21, %22 : vector<1x128xf32>
    %cst_15 = arith.constant 0.000000e+00 : f32
    %24 = vector.broadcast %cst_15 : f32 to vector<1x128xf32>
    %25 = vector.extract_strided_slice %9 {offsets = [0, 0], sizes = [64, 128], strides = [1, 1]} : vector<64x256xf32> to vector<64x128xf32>
    %26 = vector.broadcast %23 : vector<1x128xf32> to vector<64x128xf32>
    %27 = arith.subf %25, %26 : vector<64x128xf32>
    %28 = arith.mulf %27, %27 : vector<64x128xf32>
    %cst_16 = arith.constant dense<0.000000e+00> : vector<128xf32>
    %29 = vector.multi_reduction <add>, %28, %cst_16 [0] : vector<64x128xf32> to vector<128xf32>
    %30 = vector.shape_cast %29 : vector<128xf32> to vector<1x128xf32>
    %31 = arith.addf %24, %30 : vector<1x128xf32>
    %32 = vector.extract_strided_slice %9 {offsets = [0, 128], sizes = [64, 128], strides = [1, 1]} : vector<64x256xf32> to vector<64x128xf32>
    %33 = vector.broadcast %23 : vector<1x128xf32> to vector<64x128xf32>
    %34 = arith.subf %32, %33 : vector<64x128xf32>
    %35 = arith.mulf %34, %34 : vector<64x128xf32>
    %cst_17 = arith.constant dense<0.000000e+00> : vector<128xf32>
    %36 = vector.multi_reduction <add>, %35, %cst_17 [0] : vector<64x128xf32> to vector<128xf32>
    %37 = vector.shape_cast %36 : vector<128xf32> to vector<1x128xf32>
    %38 = arith.addf %31, %37 : vector<1x128xf32>
    %c0_i32 = arith.constant 0 : i32
    %39 = arith.cmpi eq, %arg1, %c0_i32 : i32
    %40 = arith.extui %39 : i1 to i32
    %c0_i32_18 = arith.constant 0 : i32
    %41 = arith.cmpi ne, %40, %c0_i32_18 : i32
    scf.if %41 {
      %cst_31 = arith.constant 0.000000e+00 : f32
      %63 = vector.broadcast %cst_31 : f32 to vector<8x128xf32>
      %c0_32 = arith.constant 0 : index
      %c0_33 = arith.constant 0 : index
      %64 = vector.load %arg7[%c0_32, %c0_33] : memref<8x128xf32, #tpu.memory_space<vmem>>, vector<8x128xf32>
      tpu.vector_store %arg7[%c0_32, %c0_33], %63 {strides = array<i32>} : memref<8x128xf32, #tpu.memory_space<vmem>>, vector<8x128xf32>,
    } else {
    }
    %42 = arith.sitofp %arg1 : i32 to f32
    %cst_19 = arith.constant 1.280000e+02 : f32
    %43 = arith.mulf %42, %cst_19 : f32
    %cst_20 = arith.constant 1.280000e+02 : f32
    %44 = arith.addf %43, %cst_20 : f32
    %cst_21 = arith.constant 1.280000e+02 : f32
    %45 = arith.divf %cst_21, %44 : f32
    %c0_22 = arith.constant 0 : index
    %c0_23 = arith.constant 0 : index
    %46 = vector.load %arg7[%c0_22, %c0_23] : memref<8x128xf32, #tpu.memory_space<vmem>>, vector<1x128xf32>
    %47 = arith.subf %23, %46 : vector<1x128xf32>
    %48 = vector.broadcast %45 : f32 to vector<1x128xf32>
    %49 = arith.mulf %47, %48 : vector<1x128xf32>
    %50 = arith.addf %46, %49 : vector<1x128xf32>
    %c0_24 = arith.constant 0 : index
    %c0_25 = arith.constant 0 : index
    %51 = vector.load %arg7[%c0_24, %c0_25] : memref<8x128xf32, #tpu.memory_space<vmem>>, vector<1x128xf32>
    tpu.vector_store %arg7[%c0_24, %c0_25], %50 {strides = array<i32>} : memref<8x128xf32, #tpu.memory_space<vmem>>, vector<1x128xf32>,
    %c1 = arith.constant 1 : index
    %c0_26 = arith.constant 0 : index
    %52 = vector.load %arg7[%c1, %c0_26] : memref<8x128xf32, #tpu.memory_space<vmem>>, vector<1x128xf32>
    %53 = arith.addf %52, %38 : vector<1x128xf32>
    %54 = arith.mulf %47, %47 : vector<1x128xf32>
    %55 = arith.mulf %43, %45 : f32
    %56 = vector.broadcast %55 : f32 to vector<1x128xf32>
    %57 = arith.mulf %54, %56 : vector<1x128xf32>
    %58 = arith.addf %53, %57 : vector<1x128xf32>
    %c1_27 = arith.constant 1 : index
    %c0_28 = arith.constant 0 : index
    %59 = vector.load %arg7[%c1_27, %c0_28] : memref<8x128xf32, #tpu.memory_space<vmem>>, vector<1x128xf32>
    tpu.vector_store %arg7[%c1_27, %c0_28], %58 {strides = array<i32>} : memref<8x128xf32, #tpu.memory_space<vmem>>, vector<1x128xf32>,
    %c0_i32_29 = arith.constant 0 : i32
    %60 = arith.cmpi eq, %arg1, %c0_i32_29 : i32
    %61 = arith.extui %60 : i1 to i32
    %c0_i32_30 = arith.constant 0 : i32
    %62 = arith.cmpi ne, %61, %c0_i32_30 : i32
    scf.if %62 {
      %c0_31 = arith.constant 0 : index
      %c0_32 = arith.constant 0 : index
      %63 = vector.load %arg7[%c0_31, %c0_32] : memref<8x128xf32, #tpu.memory_space<vmem>>, vector<8x128xf32>
      %c0_33 = arith.constant 0 : index
      %c0_34 = arith.constant 0 : index
      %c0_35 = arith.constant 0 : index
      %64 = vector.load %arg6[%c0_33, %c0_34, %c0_35] : memref<1x8x128xf32, #tpu.memory_space<vmem>>, vector<1x8x128xf32>
      %65 = vector.shape_cast %64 : vector<1x8x128xf32> to vector<8x128xf32>
      %66 = vector.shape_cast %63 : vector<8x128xf32> to vector<1x8x128xf32>
      tpu.vector_store %arg6[%c0_33, %c0_34, %c0_35], %66 {strides = array<i32>} : memref<1x8x128xf32, #tpu.memory_space<vmem>>, vector<1x8x128xf32>,
    } else {
    }
    return
  }
  func.func @transform_0(%arg0: i32, %arg1: i32) -> (i32, i32, i32, i32) {
    %c0_i32 = arith.constant 0 : i32
    %c0_i32_0 = arith.constant 0 : i32
    %c0_i32_1 = arith.constant 0 : i32
    return %arg0, %arg1, %c0_i32, %c0_i32_0 : i32, i32, i32, i32
  }
  func.func @transform_1(%arg0: i32, %arg1: i32) -> (i32, i32) {
    %c0_i32 = arith.constant 0 : i32
    %c0_i32_0 = arith.constant 0 : i32
    %c0_i32_1 = arith.constant 0 : i32
    return %c0_i32, %c0_i32_0 : i32, i32
  }
  func.func @transform_2(%arg0: i32, %arg1: i32) -> (i32, i32) {
    %c0_i32 = arith.constant 0 : i32
    %c0_i32_0 = arith.constant 0 : i32
    %c0_i32_1 = arith.constant 0 : i32
    return %c0_i32, %c0_i32_0 : i32, i32
  }
  func.func @transform_3(%arg0: i32, %arg1: i32) -> (i32, i32, i32) {
    %c0_i32 = arith.constant 0 : i32
    %c0_i32_0 = arith.constant 0 : i32
    return %arg0, %arg1, %c0_i32 : i32, i32, i32
  }
  func.func @transform_4(%arg0: i32, %arg1: i32) -> (i32, i32, i32) {
    %c0_i32 = arith.constant 0 : i32
    %c0_i32_0 = arith.constant 0 : i32
    %c0_i32_1 = arith.constant 0 : i32
    return %arg0, %c0_i32, %c0_i32_0 : i32, i32, i32
  }
}

</mosaic_0001>

<bundles_post_ra>
// kernel: tpu_custom_call.1
= control target key start
LH: loop header
LB: loop body
LE: loop exit
PB: predicated region body
PF: predicated region fallthrough
CT: control target
= control target key end

     0   :  { %10 = vsyncpa [#allocation4], 0  ;;  %s1648_s0 = inlined_call_operand.vmem [shape: f32[2,1,72,8], index: 0, kind: input, shape index: {}]   ;;  %s1649_s1 = inlined_call_operand.vmem [shape: f32[24,128], index: 1, kind: input, shape index: {}]   ;;  %s1650_s2 = inlined_call_operand.hbm [shape: f32[128,256], index: 2, kind: input, shape index: {}]   ;;  %s1651_s3 = inlined_call_operand.hbm [shape: f32[2,64,256], index: 3, kind: output, shape index: {0}]   ;;  %s1652_s4 = inlined_call_operand.hbm [shape: f32[2,8,128], index: 4, kind: output, shape index: {1}]  }
   0x1   :  { %11 = vsyncpa [#allocation5], 0 }
   0x2   :  { %13 = vsyncpa [#allocation5 + $0x1], 0 }
   0x3   :  { %14 = vsyncpa [#allocation8], 0 }
   0x4   :  { %16 = vsyncpa [#allocation8 + $0x1], 0  ;;  %s1224_s15 = smov 0   ;;  %s1226_s16 = smov 0  }
   0x5   :  { %s1228_s17 = smov 0   ;;  %s1230_s18 = smov 0  }
   0x6   :  { %s1232_s19 = smov 0   ;;  %s1234_s20 = smov 0  }
   0x7 LB: > { %s903_s21 = sadd.s32 4294967295, %s1189_s20   ;;  %s904_s22 = sadd.s32 4294967294, %s1189_s20   ;;  %s1189_s20 = sphi %s1234_s20, %s22_s20   ;;  %s1185_s19 = sphi %s1232_s19, %s1659_s19   ;;  %s1181_s18 = sphi %s1230_s18, %s1658_s18   ;;  %s1177_s17 = sphi %s1228_s17, %s1657_s17   ;;  %s1173_s16 = sphi %s1226_s16, %s1656_s16   ;;  %s1169_s15 = sphi %s1224_s15, %s1655_s15  }
   0x8   : > { %s34_s23 = sadd.s32 1, %s1185_s19  ;;  %s113_s24 = sadd.s32 1, %s1177_s17 }
   0x9   : > { %p36_p0 = scmp.ge.s32.totalorder %s34_s23, 2  ;;  %p123_p1 = scmp.ne.s32.totalorder %s1177_s17, %s1173_s16 }
   0xa   : > { %p124_p2 = scmp.eq.s32.totalorder %s903_s21, 1  ;;  %p129_p3 = scmp.ne.s32.totalorder %s1173_s16, %s1169_s15 }
   0xb   : > { %s1661_s23 = smov (%p36_p0, %s34_s23), 0  ;;  %p130_p5 = scmp.eq.s32.totalorder %s904_s22, 1 }
   0xc   : > { %p1264_p4 = por %p124_p2, %p123_p1  ;;  %s108_s26 = ssub.s32 %s1185_s19, %s1661_s23 }
   0xd   : > { %p905_p6 = scmp.ge.s32.totalorder %s1189_s20, 1  ;;  %p111_p7 = scmp.eq.s32.totalorder %s108_s26, 0 }
   0xe   : > { %p1271_p8 = por %p130_p5, %p129_p3  ;;  %p163_p9 = scmp.lt.s32.totalorder %s1189_s20, 3 }
   0xf   : > { %s1277_s28 = scalar_select %p111_p7, %s1177_s17, %s113_s24  }
  0x10   : > { %p164_p10 = pnand %p905_p6, %p163_p9  ;;  %p984_p11 = scmp.eq.s32.totalorder %s903_s21, 0 }
  0x11   : > { %s177_s5 = sshll.u32 %s1650_s2, 4  ;;  %s1191_s6 = smov [#allocation3]   ;;  %s178_s5 = int_to_ptr.hbm [resolvable:$true] %s177_s5 }
  0x12   : > { %p973_p12 = pneg %p164_p10  ;;  %s179_s7 = sshll.u32 %s1191_s6, 4  ;;  %s180_s7 = int_to_ptr.vmem [resolvable:$true] %s179_s7 }
  0x13   : > { %s1192_s8 = smov 256   ;;  %s1193_s9 = smov 16  }
  0x14   : > { %p974_p13 = pnand %p984_p11, %p973_p12  ;;  %207 = sbr.rel (%p164_p10) target bundleno = 557 (0x22d), region = 32 }
  0x16   : > { %976 = dma.hbm_to_vmem [thread:$0]  (!%p974_p13), %s178_s5, 4096, %s180_s7, [#allocation4], %s1192_s8, %s1192_s8, %s1193_s9  }
  0x19   : > { %1156 = dma.done.wait (%p984_p11), [#allocation4], 4096  }
  0x1a   : > { %1158 = vsyncadd (%p984_p11), [#allocation4], 4294963200  ;;  %p243_p0 = scmp.lt.s32.totalorder %s1181_s18, 1  ;;  %v271_v0 = vlaneseq  ;;  %s1194_s21 = smov 8   ;;  %v396_v45 = vld [vmem:[%s1649_s1 + $0x10] sm:$0xff]  ;;  %v395_v46 = vld [vmem:[%s1649_s1 + $0x8] sm:$0xff] }
  0x1b   : > { %s1195_s22 = smov 16   ;;  %438 = vmatpush.msra.mxu0 %v396_v45  ;;  %v394_v47 = vld [vmem:[%s1649_s1] sm:$0xff]  ;;  %vm374_vm2 = vcmask 64512   ;;  %vm384_vm3 = vcmask 130048   ;;  %vm397_vm4 = vcmask 195584   ;;  %v474_v45 = vld [vmem:[#allocation3 + $0x30] sm:$0xff] }
  0x1c   : > { %s244_s10 = scalar_select %p243_p0, %s1181_s18, 1  ;;  %v1284_v1 = vshrl.u32 %v271_v0, 7 }
  0x1d   : > { %439 = vmatpush.msra.mxu0 %v395_v46  ;;  %v475_v46 = vld [vmem:[#allocation3 + $0x38] sm:$0xff]  ;;  %s1486_s7 = sand.u32 1, %s1173_s16   ;;  %s1095_s6 = scalar_lea.hbm %s1651_s3, 256 }
  0x1e   : > { %s962_s11 = smul.u32 72, %s244_s10  ;;  %vm273_vm0 = vcmp.lt.s32.totalorder %v1284_v1, 7  ;;  %vm292_vm1 = vcmp.lt.s32.totalorder %v1284_v1, 6  ;;  %s910_s8 = sshll.u32 %s1486_s7, 7 }
  0x1f   : > { %440 = vmatpush.msra.mxu0 %v394_v47  ;;  %s1491_s9 = scalar_lea.vmem [#allocation6], %s910_s8  ;;  %s929_s10 = sshll.u32 %s1181_s18, 7 }
  0x20   : > { %s1289_s14 = scalar_lea.vmem %s1648_s0, %s962_s11  ;;  %s758_s13 = scalar_lea.hbm %s1651_s3, %s929_s10 }
  0x21   : > { %v1292_v2 = vld [vmem:[%s1289_s14] sm:$0xff]  ;;  %v1295_v3 = vld [vmem:[%s1289_s14 + $0x8] sm:$0xff]  ;;  %v1299_v4 = vld [vmem:[%s1289_s14 + $0x10] sm:$0xff]  ;;  %s739_s24 = scalar_lea.sflag [#allocation5], %s1486_s7 }
  0x22   : > { %v262_v5 = vrot.slane %v1292_v2, 1  ;;  %v263_v6 = vrot.slane %v1295_v3, 1  ;;  %v264_v7 = vrot.slane %v1299_v4, 1  ;;  %v1305_v8 = vld [vmem:[%s1289_s14 + $0x18] sm:$0xff]  ;;  %v283_v12 = vrot.slane %v1292_v2, 2  ;;  %v1331_v19 = vld [vmem:[%s1289_s14 + $0x20] sm:$0xff] }
  0x23   : > { %v265_v11 = vrot.slane %v1305_v8, 1  ;;  %v284_v13 = vrot.slane %v1295_v3, 2  ;;  %v285_v14 = vrot.slane %v1299_v4, 2  ;;  %v286_v18 = vrot.slane %v1305_v8, 2  ;;  %v1341_v23 = vld [vmem:[%s1289_s14 + $0x28] sm:$0xff]  ;;  %v1349_v27 = vld [vmem:[%s1289_s14 + $0x30] sm:$0xff] }
  0x24   : > { %v281_v9 = vsel %vm273_vm0, %v262_v5, %v263_v6  ;;  %v280_v10 = vsel %vm273_vm0, %v263_v6, %v264_v7  ;;  %v266_v21 = vrot.slane %v1331_v19, 1  ;;  %v287_v22 = vrot.slane %v1331_v19, 2  ;;  %v1364_v34 = vld [vmem:[%s1289_s14 + $0x38] sm:$0xff]  ;;  %v1373_v38 = vld [vmem:[%s1289_s14 + $0x40] sm:$0xff]  ;;  %s759_s14 = sshll.u32 %s1491_s9, 4  ;;  %s760_s14 = int_to_ptr.vmem [resolvable:$true] %s759_s14 }
  0x25   : > { %311 = vrot.lane.b32.xlu0 %v281_v9, %s1194_s21  ;;  %313 = vrot.lane.b32.xlu1 %v280_v10, %s1194_s21  ;;  %v279_v15 = vsel %vm273_vm0, %v264_v7, %v265_v11  ;;  %v300_v16 = vsel %vm292_vm1, %v283_v12, %v284_v13  ;;  %v299_v17 = vsel %vm292_vm1, %v284_v13, %v285_v14  ;;  %v267_v26 = vrot.slane %v1341_v23, 1  ;;  %v1419_v6 = vld [vmem:[#allocation3 + $0xf8] sm:$0xff]  ;;  %v496_v7 = vld [vmem:[#allocation3 + $0xe0] sm:$0xff] }
  0x26   : > { %315 = vrot.lane.b32.xlu2 %v279_v15, %s1194_s21  ;;  %v298_v20 = vsel %vm292_vm1, %v285_v14, %v286_v18  ;;  %v278_v24 = vsel %vm273_vm0, %v265_v11, %v266_v21  ;;  %v297_v25 = vsel %vm292_vm1, %v286_v18, %v287_v22  ;;  %v288_v29 = vrot.slane %v1341_v23, 2  ;;  %541 = vmatpush.msra.mxu2 %v1419_v6  ;;  %v1426_v11 = vld [vmem:[#allocation3 + $0xd8] sm:$0xff]  ;;  %v492_v13 = vld [vmem:[#allocation3 + $0xc0] sm:$0xff]  ;;  %v1429_v14 = vld [vmem:[#allocation3 + $0xc8] sm:$0xff] }
  0x27   : > { %v277_v28 = vsel %vm273_vm0, %v266_v21, %v267_v26  ;;  %v268_v30 = vrot.slane %v1349_v27, 1  ;;  %v289_v33 = vrot.slane %v1349_v27, 2  ;;  %v269_v36 = vrot.slane %v1364_v34, 1 }
  0x28   : > { %v296_v31 = vsel %vm292_vm1, %v287_v22, %v288_v29  ;;  %v290_v37 = vrot.slane %v1364_v34, 2  ;;  %v270_v39 = vrot.slane %v1373_v38, 1  ;;  %v291_v43 = vrot.slane %v1373_v38, 2 }
  0x29   : > { %v276_v32 = vsel %vm273_vm0, %v267_v26, %v268_v30  ;;  %v295_v35 = vsel %vm292_vm1, %v288_v29, %v289_v33  ;;  %v275_v40 = vsel %vm273_vm0, %v268_v30, %v269_v36  ;;  %v484_v26 = vld [vmem:[#allocation3 + $0x80] sm:$0xff]  ;;  %v482_v30 = vld [vmem:[#allocation3 + $0x70] sm:$0xff] }
  0x2a   : > { %v294_v41 = vsel %vm292_vm1, %v289_v33, %v290_v37  ;;  %v274_v42 = vsel %vm273_vm0, %v269_v36, %v270_v39  ;;  %v293_v44 = vsel %vm292_vm1, %v290_v37, %v291_v43  ;;  %v481_v33 = vld [vmem:[#allocation3 + $0x68] sm:$0xff]  ;;  %v478_v37 = vld [vmem:[#allocation3 + $0x50] sm:$0xff] }
  0x2d   : > { %347 = vrot.lane.b32.xlu0 %v300_v16, %s1195_s22  ;;  %349 = vrot.lane.b32.xlu1 %v299_v17, %s1195_s22  ;;  %v490_v16 = vld [vmem:[#allocation3 + $0xb0] sm:$0xff]  ;;  %v1433_v17 = vld [vmem:[#allocation3 + $0xb8] sm:$0xff] }
  0x2e   : > { %351 = vrot.lane.b32.xlu2 %v298_v20, %s1195_s22  ;;  %v1437_v20 = vld [vmem:[#allocation3 + $0xa8] sm:$0xff] }
  0x35   : > { %317 = vrot.lane.b32.xlu0 %v278_v24, %s1194_s21  ;;  %353 = vrot.lane.b32.xlu1 %v297_v25, %s1195_s22  ;;  %v486_v24 = vld [vmem:[#allocation3 + $0x90] sm:$0xff]  ;;  %v1442_v25 = vld [vmem:[#allocation3 + $0x98] sm:$0xff] }
  0x36   : > { %319 = vrot.lane.b32.xlu2 %v277_v28, %s1194_s21  ;;  %v1445_v28 = vld [vmem:[#allocation3 + $0x88] sm:$0xff] }
  0x3d   : > { %355 = vrot.lane.b32.xlu0 %v296_v31, %s1195_s22  ;;  %321 = vrot.lane.b32.xlu1 %v276_v32, %s1194_s21  ;;  %v483_v31 = vld [vmem:[#allocation3 + $0x78] sm:$0xff]  ;;  %v480_v32 = vld [vmem:[#allocation3 + $0x60] sm:$0xff] }
  0x3e   : > { %357 = vrot.lane.b32.xlu2 %v295_v35, %s1195_s22 }
  0x45   : > { %323 = vrot.lane.b32.xlu0 %v275_v40, %s1194_s21  ;;  %359 = vrot.lane.b32.xlu1 %v294_v41, %s1195_s22  ;;  %v479_v40 = vld [vmem:[#allocation3 + $0x58] sm:$0xff]  ;;  %v476_v41 = vld [vmem:[#allocation3 + $0x40] sm:$0xff] }
  0x46   : > { %325 = vrot.lane.b32.xlu2 %v274_v42, %s1194_s21  ;;  %v477_v42 = vld [vmem:[#allocation3 + $0x48] sm:$0xff] }
  0x4d   : > { %361 = vrot.lane.b32.xlu0 %v293_v44, %s1195_s22 }
  0x80   : > { %v316_v53 = vpop.permute.xlu2 %315 }
  0x81   : > { %v377_v57 = vsel %vm374_vm2, %v1299_v4, %v316_v53  ;;  %v1422_v4 = vld [vmem:[#allocation3 + $0xe8] sm:$0xff] }
  0x82   : > { %542 = vmatpush.msra.mxu2 %v1422_v4 }
  0x84   : > { %543 = vmatpush.msra.mxu2 %v1426_v11 }
  0x86   : > { %544 = vmatpush.msra.mxu2 %v1429_v14 }
  0x88   : > { %v352_v58 = vpop.permute.xlu2 %351  ;;  %545 = vmatpush.msra.mxu2 %v1433_v17 }
  0x89   : > { %v387_v59 = vsel %vm384_vm3, %v377_v57, %v352_v58 }
  0x8a   : > { %546 = vmatpush.msra.mxu2 %v1437_v20 }
  0x8c   : > { %547 = vmatpush.msra.mxu2 %v1442_v25 }
  0x8e   : > { %548 = vmatpush.msra.mxu2 %v1445_v28 }
  0x90   : > { %v320_v0 = vpop.permute.xlu2 %319  ;;  %549 = vmatpush.msra.mxu2 %v483_v31 }
  0x91   : > { %v379_v9 = vsel %vm374_vm2, %v1331_v19, %v320_v0  ;;  %v488_v19 = vld [vmem:[#allocation3 + $0xa0] sm:$0xff] }
  0x92   : > { %550 = vmatpush.msra.mxu2 %v481_v33 }
  0x94   : > { %551 = vmatpush.msra.mxu2 %v479_v40 }
  0x96   : > { %552 = vmatpush.msra.mxu2 %v477_v42 }
  0x97   : > { %v312_v48 = vpop.permute.xlu0 %311  ;;  %v314_v49 = vpop.permute.xlu1 %313 }
  0x98   : > { %v375_v50 = vsel %vm374_vm2, %v1292_v2, %v312_v48  ;;  %v376_v54 = vsel %vm374_vm2, %v1295_v3, %v314_v49  ;;  %v498_v3 = vld [vmem:[#allocation3 + $0xf0] sm:$0xff]  ;;  %v358_v22 = vpop.permute.xlu2 %357  ;;  %v473_v48 = vld [vmem:[#allocation3 + $0x28] sm:$0xff]  ;;  %553 = vmatpush.msra.mxu2 %v475_v46 }
  0x99   : > { %500 = vmatpush.msra.mxu1 %v498_v3  ;;  %930 = vmatpush.msra.mxu3 %v498_v3 }
  0x9a   : > { %554 = vmatpush.msra.mxu2 %v473_v48 }
  0x9b   : > { %501 = vmatpush.msra.mxu1 %v496_v7  ;;  %931 = vmatpush.msra.mxu3 %v496_v7 }
  0x9f   : > { %v348_v51 = vpop.permute.xlu0 %347  ;;  %v350_v55 = vpop.permute.xlu1 %349 }
  0xa0   : > { %v385_v52 = vsel %vm384_vm3, %v375_v50, %v348_v51  ;;  %v386_v56 = vsel %vm384_vm3, %v376_v54, %v350_v55  ;;  %v326_v47 = vpop.permute.xlu2 %325  ;;  %v470_v51 = vld [vmem:[#allocation3 + $0x10] sm:$0xff]  ;;  %v468_v54 = vld [vmem:[#allocation3] sm:$0xff]  ;;  %v469_v55 = vld [vmem:[#allocation3 + $0x8] sm:$0xff] }
  0xa1   : > { %913 = vmatmul.msk.f32.vlgmr.msra.gmra.mxu0 %vm397_vm4, %v385_v52  ;;  %v382_v49 = vsel %vm374_vm2, %v1364_v34, %v326_v47  ;;  %v471_v52 = vld [vmem:[#allocation3 + $0x18] sm:$0xff]  ;;  %v282_v34 = vsel %vm273_vm0, %v270_v39, %v262_v5  ;;  %v301_v5 = vsel %vm292_vm1, %v291_v43, %v283_v12 }
  0xa2   : > { %555 = vmatpush.msra.mxu2 %v471_v52  ;;  %327 = vrot.lane.b32.xlu1 %v282_v34, %s1194_s21  ;;  %s761_s21 = sshll.u32 %s758_s13, 4  ;;  %s762_s21 = int_to_ptr.hbm [resolvable:$true] %s761_s21 }
  0xa3   : > { %363 = vrot.lane.b32.xlu2 %v301_v5, %s1195_s22  ;;  %s1089_s26 = sshra.s32 %s762_s21, 4  ;;  %s1090_s26 = int_to_ptr.hbm [resolvable:$true] %s1089_s26 }
  0xa4   : > { %556 = vmatpush.msra.mxu2 %v469_v55  ;;  %s1091_s29 = scalar_lea.hbm %s1090_s26, 128  ;;  %p1096_p5 = scmp.lt.s32.totalorder %s1090_s26, %s1651_s3 }
  0xa5   : > { %p1092_p1 = scmp.ne.s32.totalorder %s1090_s26, %s1091_s29  ;;  %p1097_p6 = scmp.lt.s32.totalorder %s1095_s6, %s1091_s29 }
  0xa7   : > { %v318_v60 = vpop.permute.xlu0 %317  ;;  %v354_v62 = vpop.permute.xlu1 %353  ;;  %p1093_p2 = pnand %p1092_p1, %p1264_p4  ;;  %p1098_p7 = por %p1097_p6, %p1096_p5 }
  0xa8   : > { %v378_v61 = vsel %vm374_vm2, %v1305_v8, %v318_v60  ;;  %v494_v8 = vld [vmem:[#allocation3 + $0xd0] sm:$0xff] }
  0xa9   : > { %914 = vmatmul.msk.f32.gmra.mxu0 %vm397_vm4, %v386_v56  ;;  %v388_v63 = vsel %vm384_vm3, %v378_v61, %v354_v62  ;;  %502 = vmatpush.msra.mxu1 %v494_v8  ;;  %p1094_p3 = pneg %p1093_p2 }
  0xaa   : > { %932 = vmatpush.msra.mxu3 %v494_v8 }
  0xab   : > { %503 = vmatpush.msra.mxu1 %v492_v13  ;;  %p1099_p9 = pnand %p1098_p7, %p1094_p3 }
  0xac   : > { %933 = vmatpush.msra.mxu3 %v492_v13 }
  0xad   : > { %504 = vmatpush.msra.mxu1 %v490_v16 }
  0xae   : > { %934 = vmatpush.msra.mxu3 %v490_v16 }
  0xaf   : > { %v356_v10 = vpop.permute.xlu0 %355  ;;  %v322_v18 = vpop.permute.xlu1 %321  ;;  %505 = vmatpush.msra.mxu1 %v488_v19 }
  0xb0   : > { %v389_v15 = vsel %vm384_vm3, %v379_v9, %v356_v10  ;;  %v380_v21 = vsel %vm374_vm2, %v1341_v23, %v322_v18  ;;  %935 = vmatpush.msra.mxu3 %v488_v19 }
  0xb1   : > { %915 = vmatmul.msk.f32.gmra.mxu0 %vm397_vm4, %v387_v59  ;;  %v390_v29 = vsel %vm384_vm3, %v380_v21, %v358_v22  ;;  %506 = vmatpush.msra.mxu1 %v486_v24 }
  0xb2   : > { %936 = vmatpush.msra.mxu3 %v486_v24 }
  0xb3   : > { %507 = vmatpush.msra.mxu1 %v484_v26 }
  0xb4   : > { %937 = vmatpush.msra.mxu3 %v484_v26 }
  0xb5   : > { %508 = vmatpush.msra.mxu1 %v482_v30 }
  0xb6   : > { %938 = vmatpush.msra.mxu3 %v482_v30  ;;  %v1197_v30 = vmov 0.0  }
  0xb7   : > { %v324_v23 = vpop.permute.xlu0 %323  ;;  %v360_v36 = vpop.permute.xlu1 %359  ;;  %509 = vmatpush.msra.mxu1 %v480_v32  ;;  %698 = vst [vmem:[#allocation2] sm:$0xff] %v1197_v30 }
  0xb8   : > { %v381_v35 = vsel %vm374_vm2, %v1349_v27, %v324_v23  ;;  %939 = vmatpush.msra.mxu3 %v480_v32  ;;  %v472_v27 = vld [vmem:[#allocation3 + $0x20] sm:$0xff] }
  0xb9   : > { %916 = vmatmul.msk.f32.gmra.mxu0 %vm397_vm4, %v388_v63  ;;  %v391_v44 = vsel %vm384_vm3, %v381_v35, %v360_v36  ;;  %510 = vmatpush.msra.mxu1 %v478_v37  ;;  %v1196_v63 = vmov 128.0  }
  0xba   : > { %940 = vmatpush.msra.mxu3 %v478_v37  ;;  %1043 = vrcp.f32 %v1196_v63 }
  0xbb   : > { %511 = vmatpush.msra.mxu1 %v476_v41 }
  0xbc   : > { %941 = vmatpush.msra.mxu3 %v476_v41 }
  0xbd   : > { %512 = vmatpush.msra.mxu1 %v474_v45 }
  0xbe   : > { %942 = vmatpush.msra.mxu3 %v474_v45 }
  0xbf   : > { %v362_v50 = vpop.permute.xlu0 %361  ;;  %513 = vmatpush.msra.mxu1 %v472_v27 }
  0xc0   : > { %943 = vmatpush.msra.mxu3 %v472_v27  ;;  %v392_v53 = vsel %vm384_vm3, %v382_v49, %v362_v50 }
  0xc1   : > { %917 = vmatmul.msk.f32.gmra.mxu0 %vm397_vm4, %v389_v15  ;;  %514 = vmatpush.msra.mxu1 %v470_v51 }
  0xc2   : > { %944 = vmatpush.msra.mxu3 %v470_v51 }
  0xc3   : > { %515 = vmatpush.msra.mxu1 %v468_v54 }
  0xc4   : > { %945 = vmatpush.msra.mxu3 %v468_v54 }
  0xc6   : > { %946 = vmatpush.msrb.mxu3 %v1419_v6 }
  0xc8   : > { %947 = vmatpush.msrb.mxu3 %v1422_v4 }
  0xc9   : > { %918 = vmatmul.msk.f32.gmra.mxu0 %vm397_vm4, %v390_v29 }
  0xca   : > { %948 = vmatpush.msrb.mxu3 %v1426_v11 }
  0xcc   : > { %949 = vmatpush.msrb.mxu3 %v1429_v14 }
  0xce   : > { %950 = vmatpush.msrb.mxu3 %v1433_v17 }
  0xd0   : > { %951 = vmatpush.msrb.mxu3 %v1437_v20 }
  0xd1   : > { %919 = vmatmul.msk.f32.gmra.mxu0 %vm397_vm4, %v391_v44 }
  0xd2   : > { %952 = vmatpush.msrb.mxu3 %v1442_v25 }
  0xd4   : > { %953 = vmatpush.msrb.mxu3 %v1445_v28 }
  0xd6   : > { %954 = vmatpush.msrb.mxu3 %v483_v31 }
  0xd8   : > { %955 = vmatpush.msrb.mxu3 %v481_v33 }
  0xd9   : > { %920 = vmatmul.msk.f32.gmra.mxu0 %vm397_vm4, %v392_v53 }
  0xda   : > { %956 = vmatpush.msrb.mxu3 %v479_v40 }
  0xdc   : > { %957 = vmatpush.msrb.mxu3 %v477_v42 }
  0xde   : > { %958 = vmatpush.msrb.mxu3 %v475_v46 }
  0xe0   : > { %959 = vmatpush.msrb.mxu3 %v473_v48 }
  0xe2   : > { %960 = vmatpush.msrb.mxu3 %v471_v52 }
  0xe4   : > { %961 = vmatpush.msrb.mxu3 %v469_v55 }
  0xfd   : > { %v364_v43 = vpop.permute.xlu2 %363 }
 0x114   : > { %v328_v1 = vpop.permute.xlu1 %327 }
 0x115   : > { %v383_v12 = vsel %vm374_vm2, %v1373_v38, %v328_v1  ;;  %v1044_v38 = vpop.eup %1043 }
 0x116   : > { %v393_v62 = vsel %vm384_vm3, %v383_v12, %v364_v43  ;;  %v627_v3 = vmul.f32 128.0, %v1044_v38  ;;  %vm631_vm5 = vweird.f32 %v1044_v38 }
 0x117   : > { %921 = vmatmul.msk.f32.gmra.mxu0 %vm397_vm4, %v393_v62 }
 0x118   : > { %v628_v7 = vsub.f32 1.0, %v627_v3 }
 0x11a   : > { %v629_v9 = vmul.f32 %v1044_v38, %v628_v7 }
 0x11c   : > { %v630_v10 = vadd.f32 %v1044_v38, %v629_v9 }
 0x11e   : > { %v442_v56 = vpop.f32.mrf.mxu0  ;;  %v1503_v8 = vsel %vm631_vm5, %v1044_v38, %v630_v10 }
 0x11f   : > { %516 = vmatmul.f32.vlgmr.msra.gmra.mxu1 %v442_v56  ;;  %557 = vmatmul.f32.vlgmr.msra.gmra.mxu2 %v442_v56  ;;  %963 = vpush %v1503_v8 }
 0x126   : > { %v445_v57 = vpop.f32.mrf.mxu0 }
 0x127   : > { %519 = vmatmul.f32.gmra.mxu1 %v445_v57  ;;  %560 = vmatmul.f32.gmra.mxu2 %v445_v57 }
 0x12e   : > { %v448_v58 = vpop.f32.mrf.mxu0 }
 0x12f   : > { %522 = vmatmul.f32.gmra.mxu1 %v448_v58  ;;  %563 = vmatmul.f32.gmra.mxu2 %v448_v58 }
 0x136   : > { %v451_v39 = vpop.f32.mrf.mxu0 }
 0x137   : > { %525 = vmatmul.f32.gmra.mxu1 %v451_v39  ;;  %566 = vmatmul.f32.gmra.mxu2 %v451_v39 }
 0x13e   : > { %v454_v59 = vpop.f32.mrf.mxu0 }
 0x13f   : > { %528 = vmatmul.f32.gmra.mxu1 %v454_v59  ;;  %569 = vmatmul.f32.gmra.mxu2 %v454_v59 }
 0x146   : > { %v457_v60 = vpop.f32.mrf.mxu0 }
 0x147   : > { %531 = vmatmul.f32.gmra.mxu1 %v457_v60  ;;  %572 = vmatmul.f32.gmra.mxu2 %v457_v60 }
 0x14e   : > { %v460_v61 = vpop.f32.mrf.mxu0 }
 0x14f   : > { %534 = vmatmul.f32.vlgmr.msra.gmra.mxu3 %v460_v61 }
 0x156   : > { %v463_v2 = vpop.f32.mrf.mxu0 }
 0x157   : > { %537 = vmatmul.f32.gmra.mxu3 %v463_v2 }
 0x15f   : > { %575 = vmatmul.f32.vlgmr.msrb.gmra.mxu3 %v460_v61 }
 0x167   : > { %578 = vmatmul.f32.gmra.mxu3 %v463_v2 }
 0x19c   : > { %v1489_v0 = vpop.f32.mrf.mxu1 }
 0x19d   : > { %582 = vst [vmem:[%s1491_s9] sm:$0xff] %v1489_v0 }
 0x1a2   : > { %v1495_v6 = vpop.f32.mrf.mxu2 }
 0x1a3   : > { %583 = vst [vmem:[%s1491_s9 + $0x8] sm:$0xff] %v1495_v6 }
 0x1a4   : > { %v1499_v4 = vpop.f32.mrf.mxu1 }
 0x1a5   : > { %584 = vst [vmem:[%s1491_s9 + $0x10] sm:$0xff] %v1499_v4  ;;  %v598_v22 = vadd.f32 %v1499_v4, %v1489_v0 }
 0x1aa   : > { %v1505_v11 = vpop.f32.mrf.mxu2 }
 0x1ab   : > { %585 = vst [vmem:[%s1491_s9 + $0x18] sm:$0xff] %v1505_v11  ;;  %v612_v23 = vadd.f32 %v1505_v11, %v1495_v6 }
 0x1ac   : > { %v1510_v13 = vpop.f32.mrf.mxu1 }
 0x1ad   : > { %586 = vst [vmem:[%s1491_s9 + $0x20] sm:$0xff] %v1510_v13  ;;  %v599_v24 = vadd.f32 %v598_v22, %v1510_v13 }
 0x1b2   : > { %v1514_v14 = vpop.f32.mrf.mxu2 }
 0x1b3   : > { %587 = vst [vmem:[%s1491_s9 + $0x28] sm:$0xff] %v1514_v14  ;;  %v613_v33 = vadd.f32 %v612_v23, %v1514_v14 }
 0x1b4   : > { %v1518_v15 = vpop.f32.mrf.mxu1 }
 0x1b5   : > { %588 = vst [vmem:[%s1491_s9 + $0x30] sm:$0xff] %v1518_v15  ;;  %v600_v25 = vadd.f32 %v599_v24, %v1518_v15 }
 0x1ba   : > { %v1522_v16 = vpop.f32.mrf.mxu2 }
 0x1bb   : > { %589 = vst [vmem:[%s1491_s9 + $0x38] sm:$0xff] %v1522_v16  ;;  %v614_v36 = vadd.f32 %v613_v33, %v1522_v16 }
 0x1bc   : > { %v1526_v17 = vpop.f32.mrf.mxu1 }
 0x1bd   : > { %590 = vst [vmem:[%s1491_s9 + $0x40] sm:$0xff] %v1526_v17  ;;  %v601_v26 = vadd.f32 %v600_v25, %v1526_v17 }
 0x1c2   : > { %v1530_v18 = vpop.f32.mrf.mxu2 }
 0x1c3   : > { %591 = vst [vmem:[%s1491_s9 + $0x48] sm:$0xff] %v1530_v18  ;;  %v615_v40 = vadd.f32 %v614_v36, %v1530_v18 }
 0x1c4   : > { %v1534_v19 = vpop.f32.mrf.mxu1 }
 0x1c5   : > { %592 = vst [vmem:[%s1491_s9 + $0x50] sm:$0xff] %v1534_v19  ;;  %v602_v29 = vadd.f32 %v601_v26, %v1534_v19 }
 0x1ca   : > { %v1538_v20 = vpop.f32.mrf.mxu2 }
 0x1cb   : > { %593 = vst [vmem:[%s1491_s9 + $0x58] sm:$0xff] %v1538_v20  ;;  %v616_v41 = vadd.f32 %v615_v40, %v1538_v20 }
 0x1d2   : > { %v1542_v21 = vpop.f32.mrf.mxu3 }
 0x1d3   : > { %594 = vst [vmem:[%s1491_s9 + $0x60] sm:$0xff] %v1542_v21  ;;  %v603_v31 = vadd.f32 %v602_v29, %v1542_v21 }
 0x1da   : > { %v1551_v28 = vpop.f32.mrf.mxu3 }
 0x1db   : > { %596 = vst [vmem:[%s1491_s9 + $0x70] sm:$0xff] %v1551_v28  ;;  %v604_v32 = vadd.f32 %v603_v31, %v1551_v28 }
 0x1dd   : > { %v605_v37 = vrot.slane %v604_v32, 4 }
 0x1df   : > { %v606_v42 = vadd.f32 %v605_v37, %v604_v32 }
 0x1e1   : > { %v607_v46 = vrot.slane %v606_v42, 2 }
 0x1e2   : > { %v1562_v35 = vpop.f32.mrf.mxu3 }
 0x1e3   : > { %595 = vst [vmem:[%s1491_s9 + $0x68] sm:$0xff] %v1562_v35  ;;  %v617_v44 = vadd.f32 %v616_v41, %v1562_v35 }
 0x1ea   : > { %v579_v45 = vpop.f32.mrf.mxu3 }
 0x1eb   : > { %597 = vst [vmem:[%s1491_s9 + $0x78] sm:$0xff] %v579_v45  ;;  %v618_v47 = vadd.f32 %v617_v44, %v579_v45 }
 0x1ec   : > { %1102 = shalt.err (!%p1099_p9)
}
 0x1ed   : > { %s1198_s9 = smov 256   ;;  %v619_v27 = vrot.slane %v618_v47, 4  ;;  %v608_v48 = vadd.f32 %v607_v46, %v606_v42  ;;  %s1591_s11 = spop %963  ;;  %v719_v10 = vld [vmem:[#allocation2] sm:$0x1] }
 0x1ee   : > { %969 = dma.vmem_to_hbm [thread:$0]  (%p1264_p4), %s760_s14, 2048, %s762_s21, %s739_s24, %s1198_s9, %s1198_s9, %s1195_s22  }
 0x1ef   : > { %v620_v49 = vadd.f32 %v619_v27, %v618_v47  ;;  %v609_v51 = vrot.slane %v608_v48, 1  ;;  %s718_s22 = smul.f32 128.0, %s1591_s11  ;;  %s911_s13 = sshll.u32 %s1486_s7, 3 }
 0x1f0   : > { %s926_s14 = sshll.u32 %s1181_s18, 3  ;;  %s242_s29 = scalar_lea.vmem [#allocation7], %s911_s13 }
 0x1f1   : > { %v621_v50 = vrot.slane %v620_v49, 2  ;;  %v610_v54 = vadd.f32 %v609_v51, %v608_v48  ;;  %s728_s12 = smul.f32 0.0, %s718_s22  ;;  %s774_s26 = scalar_lea.hbm %s1652_s4, %s926_s14 }
 0x1f2   : > { %s776_s30 = sshll.u32 %s242_s29, 4  ;;  %s778_s5 = sshll.u32 %s774_s26, 4  ;;  %s777_s30 = int_to_ptr.vmem [resolvable:$true] %s776_s30  ;;  %s779_s5 = int_to_ptr.hbm [resolvable:$true] %s778_s5 }
 0x1f3   : > { %v622_v52 = vadd.f32 %v621_v50, %v620_v49  ;;  %s744_s6 = scalar_lea.sflag [#allocation8], %s1486_s7  ;;  %s1117_s8 = sshra.s32 %s779_s5, 4  ;;  %s1118_s8 = int_to_ptr.hbm [resolvable:$true] %s1117_s8 }
 0x1f4   : > { %s1119_s10 = scalar_lea.hbm %s1118_s8, 8  ;;  %s1123_s11 = scalar_lea.hbm %s1652_s4, 16 }
 0x1f5   : > { %v623_v53 = vrot.slane %v622_v52, 1  ;;  %p1120_p10 = scmp.ne.s32.totalorder %s1118_s8, %s1119_s10  ;;  %p1124_p13 = scmp.lt.s32.totalorder %s1118_s8, %s1652_s4 }
 0x1f6   : > { %p1125_p0 = scmp.lt.s32.totalorder %s1123_s11, %s1119_s10 }
 0x1f7   : > { %v624_v55 = vadd.f32 %v623_v53, %v622_v52  ;;  %p1121_p11 = pnand %p1120_p10, %p1264_p4 }
 0x1f8   : > { %p1126_p1 = por %p1125_p0, %p1124_p13 }
 0x1f9   : > { %v625_v34 = vadd.f32 %v624_v55, %v610_v54  ;;  %p1122_p12 = pneg %p1121_p11 }
 0x1fb   : > { %v633_v56 = vmul.f32 %v1503_v8, %v625_v34  ;;  %p1127_p2 = pnand %p1126_p1, %p1122_p12 }
 0x1fd   : > { %v664_v57 = vsub.f32 %v1495_v6, %v633_v56  ;;  %v665_v58 = vsub.f32 %v1505_v11, %v633_v56  ;;  %v666_v5 = vsub.f32 %v1514_v14, %v633_v56  ;;  %v667_v39 = vsub.f32 %v1522_v16, %v633_v56 }
 0x1fe   : > { %v668_v61 = vsub.f32 %v1530_v18, %v633_v56  ;;  %v634_v12 = vsub.f32 %v1489_v0, %v633_v56  ;;  %v635_v43 = vsub.f32 %v1499_v4, %v633_v56  ;;  %v636_v62 = vsub.f32 %v1510_v13, %v633_v56 }
 0x1ff   : > { %v672_v59 = vmul.f32 %v664_v57, %v664_v57  ;;  %v673_v60 = vmul.f32 %v665_v58, %v665_v58  ;;  %v674_v2 = vmul.f32 %v666_v5, %v666_v5  ;;  %v669_v63 = vsub.f32 %v1538_v20, %v633_v56  ;;  %v725_v58 = vld [vmem:[#allocation2 + $0x1] sm:$0x1] }
 0x200   : > { %v675_v38 = vmul.f32 %v667_v39, %v667_v39  ;;  %v637_v6 = vsub.f32 %v1518_v15, %v633_v56  ;;  %v642_v7 = vmul.f32 %v634_v12, %v634_v12  ;;  %v643_v9 = vmul.f32 %v635_v43, %v635_v43 }
 0x201   : > { %v680_v1 = vadd.f32 %v673_v60, %v672_v59  ;;  %v670_v8 = vsub.f32 %v1562_v35, %v633_v56  ;;  %v676_v11 = vmul.f32 %v668_v61, %v668_v61  ;;  %v721_v14 = vstv %s718_s22 }
 0x202   : > { %v638_v0 = vsub.f32 %v1526_v17, %v633_v56  ;;  %v644_v4 = vmul.f32 %v636_v62, %v636_v62  ;;  %v650_v18 = vadd.f32 %v643_v9, %v642_v7  ;;  %v671_v13 = vsub.f32 %v579_v45, %v633_v56  ;;  %v466_v17 = vpop.f32.mrf.mxu0 }
 0x203   : > { %v681_v3 = vadd.f32 %v680_v1, %v674_v2  ;;  %v677_v22 = vmul.f32 %v669_v63, %v669_v63  ;;  %v720_v20 = vsub.f32 %v633_v56, %v719_v10  ;;  %v639_v25 = vsub.f32 %v1534_v19, %v633_v56 }
 0x204   : > { %v645_v15 = vmul.f32 %v637_v6, %v637_v6  ;;  %v651_v26 = vadd.f32 %v650_v18, %v644_v4  ;;  %v678_v29 = vmul.f32 %v670_v8, %v670_v8  ;;  %v640_v23 = vsub.f32 %v1542_v21, %v633_v56 }
 0x205   : > { %v682_v16 = vadd.f32 %v681_v3, %v675_v38  ;;  %v722_v30 = vmul.f32 %v721_v14, %v720_v20  ;;  %v646_v32 = vmul.f32 %v638_v0, %v638_v0  ;;  %v679_v35 = vmul.f32 %v671_v13, %v671_v13 }
 0x206   : > { %v652_v33 = vadd.f32 %v651_v26, %v645_v15  ;;  %v641_v40 = vsub.f32 %v1551_v28, %v633_v56  ;;  %v647_v41 = vmul.f32 %v639_v25, %v639_v25  ;;  %v648_v44 = vmul.f32 %v640_v23, %v640_v23 }
 0x207   : > { %v683_v24 = vadd.f32 %v682_v16, %v676_v11  ;;  %v723_v36 = vadd.f32 %v722_v30, %v719_v10  ;;  %v727_v57 = vmul.f32 %v720_v20, %v720_v20  ;;  %v729_v5 = vstv %s728_s12 }
 0x208   : > { %v653_v42 = vadd.f32 %v652_v33, %v646_v32  ;;  %v649_v47 = vmul.f32 %v641_v40, %v641_v40 }
 0x209   : > { %v684_v31 = vadd.f32 %v683_v24, %v677_v22  ;;  %724 = vst [vmem:[#allocation2] sm:$0x1] %v723_v36  ;;  %v730_v60 = vmul.f32 %v729_v5, %v727_v57 }
 0x20a   : > { %v654_v45 = vadd.f32 %v653_v42, %v647_v41 }
 0x20b   : > { %v685_v37 = vadd.f32 %v684_v31, %v678_v29 }
 0x20c   : > { %v655_v27 = vadd.f32 %v654_v45, %v648_v44 }
 0x20d   : > { %v686_v19 = vadd.f32 %v685_v37, %v679_v35 }
 0x20e   : > { %v656_v21 = vadd.f32 %v655_v27, %v649_v47 }
 0x20f   : > { %v687_v46 = vrot.slane %v686_v19, 4 }
 0x210   : > { %v657_v50 = vrot.slane %v656_v21, 4 }
 0x211   : > { %v688_v48 = vadd.f32 %v687_v46, %v686_v19 }
 0x212   : > { %v658_v52 = vadd.f32 %v657_v50, %v656_v21 }
 0x213   : > { %v689_v49 = vrot.slane %v688_v48, 2 }
 0x214   : > { %v659_v28 = vrot.slane %v658_v52, 2 }
 0x215   : > { %v690_v51 = vadd.f32 %v689_v49, %v688_v48 }
 0x216   : > { %v660_v54 = vadd.f32 %v659_v28, %v658_v52 }
 0x217   : > { %v691_v53 = vrot.slane %v690_v51, 1 }
 0x218   : > { %v661_v34 = vrot.slane %v660_v54, 1 }
 0x219   : > { %v692_v55 = vadd.f32 %v691_v53, %v690_v51 }
 0x21a   : > { %v662_v56 = vadd.f32 %v661_v34, %v660_v54 }
 0x21c   : > { %v693_v39 = vadd.f32 %v692_v55, %v662_v56 }
 0x21e   : > { %v726_v59 = vadd.f32 %v725_v58, %v693_v39 }
 0x220   : > { %v731_v61 = vadd.f32 %v730_v60, %v726_v59 }
 0x222   : > { %732 = vst [vmem:[#allocation2 + $0x1] sm:$0x1] %v731_v61 }
 0x229   : > { %v736_v2 = vld [vmem:[#allocation2] sm:$0xff] }
 0x22a   : > { %737 = vst [vmem:[%s242_s29] sm:$0xff] %v736_v2 }
 0x22b   : > { %1130 = shalt.err (!%p1127_p2)
}
 0x22c   : > { %970 = dma.vmem_to_hbm [thread:$0]  (%p1264_p4), %s777_s30, 128, %s779_s5, %s744_s6  }
 0x22d PF: > { %p986_p3 = scmp.ge.s32.totalorder %s1189_s20, 2  ;;  %s790_s7 = sand.u32 1, %s1169_s15  }
 0x22e   : > { %s791_s13 = scalar_lea.sflag [#allocation5], %s790_s7 }
 0x22f   : > { %p978_p5 = pnand %p986_p3, %p1271_p8 }
 0x231   : > { %p979_p6 = pneg %p978_p5 }
 0x233   : > { %1160 = dma.done.wait (%p979_p6), %s791_s13, 2048  }
 0x234   : > { %1162 = vsyncadd (%p979_p6), %s791_s13, 4294965248  ;;  %s801_s14 = scalar_lea.sflag [#allocation8], %s790_s7 }
 0x235   : > { %1164 = dma.done.wait (%p979_p6), %s801_s14, 128  }
 0x236   : > { %1166 = vsyncadd (%p979_p6), %s801_s14, 4294967168  ;;  %s22_s20 = sadd.s32 1, %s1189_s20   ;;  %s1655_s15 = smov %s1173_s16 }
 0x237   : > { %p19_p7 = scmp.ge.s32.totalorder %s22_s20, 4   ;;  %s1656_s16 = smov %s1177_s17 }
 0x238   : > { %s1657_s17 = smov %s1277_s28  ;;  %s1658_s18 = smov %s1185_s19 }
 0x239   : > { %s1659_s19 = smov %s1661_s23  ;;  %21 = sbr.rel (!%p19_p7) target bundleno = 7 (0x7), region = 97 }
 0x23e   :  { %807 = vsyncpa [#allocation4], 1 }
 0x23f   :  { %809 = vsyncpa [#allocation4 + $0x1], 1 }
 0x240   :  { %810 = vsyncpa [#allocation5], 1 }
 0x241   :  { %812 = vsyncpa [#allocation5 + $0x1], 1 }
 0x242   :  { %813 = vsyncpa [#allocation8], 1 }
 0x243   :  { %815 = vsyncpa [#allocation8 + $0x1], 1 }

</bundles_post_ra>
